<compile_context>
chip_gen: v7x
topology: tpu7x:2x2x1
jax: 0.10.0
libtpu: 0.0.40
codegen_flags: <defaults>
</compile_context>

<pallas_src>
import jax
import jax.numpy as jnp
from jax.experimental import pallas as pl
from jax.experimental.pallas import tpu as pltpu


# ------------------- Module hierarchy (mirrors PyTorch) --------------------

class TwoWaysModule(object):
    """Marker: modules of this type receive (h, conditions)."""
    pass


class Linear:
    """y = h @ w + b   (w: [D_in, D_out], b: [1, D_out])."""

    def __init__(self, w, b):
        self.params = [w, b]

    def apply(self, h, w, b):
        return jnp.dot(h, w, preferred_element_type=jnp.float32) + b


class Tanh:
    def __init__(self):
        self.params = []

    def apply(self, h):
        return jnp.tanh(h)


class CondFiLM(TwoWaysModule):
    """FiLM conditioning — the TwoWaysModule path.

    Weights are concatenated so scale|shift come from ONE [D_COND, 2*D_H]
    matmul (lane-dense, 128-wide result), then statically sliced.
    """

    def __init__(self, ws, bs, wt, bt):
        self.d_h = ws.shape[1]
        self.params = [
            jnp.concatenate([ws, wt], axis=1),  # [D_COND, 2*D_H]
            jnp.concatenate([bs, bt], axis=1),  # [1, 2*D_H]
        ]

    def apply(self, h, cond, wswt, bsbt):
        sb = jnp.dot(cond, wswt, preferred_element_type=jnp.float32) + bsbt
        scale = sb[:, : self.d_h]
        shift = sb[:, self.d_h:]
        return h * scale + shift


def _pick_tile_b(B):
    """Largest batch tile (multiple of 8, <= 512) that evenly divides B."""
    for t in (512, 256, 128, 64, 32, 16, 8):
        if B >= t and B % t == 0:
            return t
    return B  # whole-batch tile (block == full dim is always legal)


class TwoWaysSequential:
    """Exact forward semantics of the PyTorch TwoWaysSequential, fused into a
    single Pallas kernel (the dispatch loop runs at trace time)."""

    def __init__(self, *modules):
        self.module_list = list(modules)
        self._flat_params = [p for m in self.module_list for p in m.params]
        self._jitted = jax.jit(self._forward)

    # The module chain on in-register values — used both inside the kernel
    # body and (abstractly) to derive the output shape/dtype.
    def _chain(self, h, cond, flat_params):
        idx = 0
        for m in self.module_list:
            n = len(m.params)
            pv = flat_params[idx: idx + n]
            idx += n
            if isinstance(m, TwoWaysModule):
                h = m.apply(h, cond, *pv)
            else:
                h = m.apply(h, *pv)
        return h

    def _forward(self, inputs, conditions, *flat_params):
        B, d_in = inputs.shape
        d_cond = conditions.shape[1]

        # Output shape/dtype from an abstract trace of the same chain.
        out_struct = jax.eval_shape(
            lambda x, c, *ps: self._chain(x, c, list(ps)),
            inputs, conditions, *flat_params)
        d_out = out_struct.shape[1]

        tile_b = _pick_tile_b(B)
        grid = (B // tile_b,)

        def kernel(*refs):
            x_ref, c_ref = refs[0], refs[1]
            o_ref = refs[-1]
            pvals = [r[...] for r in refs[2:-1]]
            h = self._chain(x_ref[...], c_ref[...], pvals)
            o_ref[...] = h.astype(o_ref.dtype)

        in_specs = [
            pl.BlockSpec((tile_b, d_in), lambda i: (i, 0)),
            pl.BlockSpec((tile_b, d_cond), lambda i: (i, 0)),
        ] + [
            # Whole-parameter blocks with constant index_maps: stay resident
            # in VMEM across batch tiles (no re-DMA).
            pl.BlockSpec(p.shape, lambda i: (0, 0))
            for p in flat_params
        ]
        out_spec = pl.BlockSpec((tile_b, d_out), lambda i: (i, 0))

        return pl.pallas_call(
            kernel,
            out_shape=jax.ShapeDtypeStruct((B, d_out), out_struct.dtype),
            grid=grid,
            in_specs=in_specs,
            out_specs=out_spec,
            compiler_params=pltpu.CompilerParams(
                dimension_semantics=("parallel",),
            ),
        )(inputs, conditions, *flat_params)

    def __call__(self, inputs, conditions):
        return self._jitted(inputs, conditions, *self._flat_params)


# ---------------------------------- main -----------------------------------

if __name__ == "__main__":
    B, D_IN, D_H, D_COND, D_OUT = 8, 32, 64, 16, 32

    key = jax.random.PRNGKey(0)
    ks = jax.random.split(key, 8)

    # Deterministic init (PyTorch Linear weight [out,in] -> stored [in,out]).
    w1 = jax.random.normal(ks[0], (D_IN, D_H), jnp.float32) * 0.1
    b1 = jax.random.normal(ks[1], (1, D_H), jnp.float32) * 0.1
    ws = jax.random.normal(ks[2], (D_COND, D_H), jnp.float32) * 0.1
    bs = jnp.ones((1, D_H), jnp.float32)   # scale bias -> identity-ish FiLM
    wt = jax.random.normal(ks[3], (D_COND, D_H), jnp.float32) * 0.1
    bt = jnp.zeros((1, D_H), jnp.float32)
    w2 = jax.random.normal(ks[4], (D_H, D_OUT), jnp.float32) * 0.1
    b2 = jax.random.normal(ks[5], (1, D_OUT), jnp.float32) * 0.1

    model = TwoWaysSequential(
        Linear(w1, b1),
        Tanh(),
        CondFiLM(ws, bs, wt, bt),
        Linear(w2, b2),
    )

    inputs = jax.random.normal(ks[6], (B, D_IN), jnp.float32)
    conditions = jax.random.normal(ks[7], (B, D_COND), jnp.float32)

    out = model(inputs, conditions)
    out = jax.block_until_ready(out)

    # Pure-JAX reference (same math, no Pallas) for a correctness check.
    h_ref = jnp.tanh(inputs @ w1 + b1)
    scale_ref = conditions @ ws + bs
    shift_ref = conditions @ wt + bt
    ref = (h_ref * scale_ref + shift_ref) @ w2 + b2

    assert out.shape == (B, D_OUT)
    assert jnp.allclose(out, ref, atol=1e-5, rtol=1e-5), "mismatch vs reference"

    print("KERNEL_OK")
</pallas_src>

<mosaic_0001>
module attributes {stable_mosaic.version = 11 : i64} {
  func.func @kernel(%arg0: i32, %arg1: memref<8x32xf32, #tpu.memory_space<vmem>>, %arg2: memref<8x16xf32, #tpu.memory_space<vmem>>, %arg3: memref<32x64xf32, #tpu.memory_space<vmem>>, %arg4: memref<1x64xf32, #tpu.memory_space<vmem>>, %arg5: memref<16x128xf32, #tpu.memory_space<vmem>>, %arg6: memref<1x128xf32, #tpu.memory_space<vmem>>, %arg7: memref<64x32xf32, #tpu.memory_space<vmem>>, %arg8: memref<1x32xf32, #tpu.memory_space<vmem>>, %arg9: memref<8x32xf32, #tpu.memory_space<vmem>>) attributes {dimension_semantics = [#tpu.dimension_semantics<parallel>], iteration_bounds = array<i64: 1>, scalar_prefetch = 0 : i64, scratch_operands = 0 : i64, tpu.core_type = #tpu.core_type<tc>, window_params = [{transform_indices = @transform_0, window_bounds = array<i64: 8, 32>}, {transform_indices = @transform_1, window_bounds = array<i64: 8, 16>}, {pipeline_mode = #tpu.pipeline_mode<synchronous>, transform_indices = @transform_2, window_bounds = array<i64: 32, 64>}, {pipeline_mode = #tpu.pipeline_mode<synchronous>, transform_indices = @transform_3, window_bounds = array<i64: 1, 64>}, {pipeline_mode = #tpu.pipeline_mode<synchronous>, transform_indices = @transform_4, window_bounds = array<i64: 16, 128>}, {pipeline_mode = #tpu.pipeline_mode<synchronous>, transform_indices = @transform_5, window_bounds = array<i64: 1, 128>}, {pipeline_mode = #tpu.pipeline_mode<synchronous>, transform_indices = @transform_6, window_bounds = array<i64: 64, 32>}, {pipeline_mode = #tpu.pipeline_mode<synchronous>, transform_indices = @transform_7, window_bounds = array<i64: 1, 32>}, {transform_indices = @transform_8, window_bounds = array<i64: 8, 32>}]} {
    %c0 = arith.constant 0 : index
    %c0_0 = arith.constant 0 : index
    %0 = vector.load %arg3[%c0, %c0_0] : memref<32x64xf32, #tpu.memory_space<vmem>>, vector<32x64xf32>
    %c0_1 = arith.constant 0 : index
    %c0_2 = arith.constant 0 : index
    %1 = vector.load %arg4[%c0_1, %c0_2] : memref<1x64xf32, #tpu.memory_space<vmem>>, vector<1x64xf32>
    %c0_3 = arith.constant 0 : index
    %c0_4 = arith.constant 0 : index
    %2 = vector.load %arg5[%c0_3, %c0_4] : memref<16x128xf32, #tpu.memory_space<vmem>>, vector<16x128xf32>
    %c0_5 = arith.constant 0 : index
    %c0_6 = arith.constant 0 : index
    %3 = vector.load %arg6[%c0_5, %c0_6] : memref<1x128xf32, #tpu.memory_space<vmem>>, vector<1x128xf32>
    %c0_7 = arith.constant 0 : index
    %c0_8 = arith.constant 0 : index
    %4 = vector.load %arg7[%c0_7, %c0_8] : memref<64x32xf32, #tpu.memory_space<vmem>>, vector<64x32xf32>
    %c0_9 = arith.constant 0 : index
    %c0_10 = arith.constant 0 : index
    %5 = vector.load %arg8[%c0_9, %c0_10] : memref<1x32xf32, #tpu.memory_space<vmem>>, vector<1x32xf32>
    %c0_11 = arith.constant 0 : index
    %c0_12 = arith.constant 0 : index
    %6 = vector.load %arg1[%c0_11, %c0_12] : memref<8x32xf32, #tpu.memory_space<vmem>>, vector<8x32xf32>
    %c0_13 = arith.constant 0 : index
    %c0_14 = arith.constant 0 : index
    %7 = vector.load %arg2[%c0_13, %c0_14] : memref<8x16xf32, #tpu.memory_space<vmem>>, vector<8x16xf32>
    %cst = arith.constant dense<0.000000e+00> : vector<8x64xf32>
    %8 = tpu.matmul %6, %0, %cst {dimension_numbers = #tpu.dot_dimension_numbers<[1], [0], [0], [1], [0, 0, 1, 1], [], []>} : vector<8x32xf32>, vector<32x64xf32>, vector<8x64xf32> -> vector<8x64xf32>
    %9 = vector.broadcast %1 : vector<1x64xf32> to vector<8x64xf32>
    %10 = arith.addf %8, %9 : vector<8x64xf32>
    %11 = math.tanh %10 : vector<8x64xf32>
    %cst_15 = arith.constant dense<0.000000e+00> : vector<8x128xf32>
    %12 = tpu.matmul %7, %2, %cst_15 {dimension_numbers = #tpu.dot_dimension_numbers<[1], [0], [0], [1], [0, 0, 1, 1], [], []>} : vector<8x16xf32>, vector<16x128xf32>, vector<8x128xf32> -> vector<8x128xf32>
    %13 = vector.broadcast %3 : vector<1x128xf32> to vector<8x128xf32>
    %14 = arith.addf %12, %13 : vector<8x128xf32>
    %15 = vector.extract_strided_slice %14 {offsets = [0, 0], sizes = [8, 64], strides = [1, 1]} : vector<8x128xf32> to vector<8x64xf32>
    %16 = vector.extract_strided_slice %14 {offsets = [0, 64], sizes = [8, 64], strides = [1, 1]} : vector<8x128xf32> to vector<8x64xf32>
    %17 = arith.mulf %11, %15 : vector<8x64xf32>
    %18 = arith.addf %17, %16 : vector<8x64xf32>
    %cst_16 = arith.constant dense<0.000000e+00> : vector<8x32xf32>
    %19 = tpu.matmul %18, %4, %cst_16 {dimension_numbers = #tpu.dot_dimension_numbers<[1], [0], [0], [1], [0, 0, 1, 1], [], []>} : vector<8x64xf32>, vector<64x32xf32>, vector<8x32xf32> -> vector<8x32xf32>
    %20 = vector.broadcast %5 : vector<1x32xf32> to vector<8x32xf32>
    %21 = arith.addf %19, %20 : vector<8x32xf32>
    %c0_17 = arith.constant 0 : index
    %c0_18 = arith.constant 0 : index
    %22 = vector.load %arg9[%c0_17, %c0_18] : memref<8x32xf32, #tpu.memory_space<vmem>>, vector<8x32xf32>
    tpu.vector_store %arg9[%c0_17, %c0_18], %21 {strides = array<i32>} : memref<8x32xf32, #tpu.memory_space<vmem>>, vector<8x32xf32>,
    return
  }
  func.func @transform_0(%arg0: i32) -> (i32, i32) {
    %c0_i32 = arith.constant 0 : i32
    %c0_i32_0 = arith.constant 0 : i32
    return %arg0, %c0_i32 : i32, i32
  }
  func.func @transform_1(%arg0: i32) -> (i32, i32) {
    %c0_i32 = arith.constant 0 : i32
    %c0_i32_0 = arith.constant 0 : i32
    return %arg0, %c0_i32 : i32, i32
  }
  func.func @transform_2(%arg0: i32) -> (i32, i32) {
    %c0_i32 = arith.constant 0 : i32
    %c0_i32_0 = arith.constant 0 : i32
    %c0_i32_1 = arith.constant 0 : i32
    return %c0_i32, %c0_i32_0 : i32, i32
  }
  func.func @transform_3(%arg0: i32) -> (i32, i32) {
    %c0_i32 = arith.constant 0 : i32
    %c0_i32_0 = arith.constant 0 : i32
    %c0_i32_1 = arith.constant 0 : i32
    return %c0_i32, %c0_i32_0 : i32, i32
  }
  func.func @transform_4(%arg0: i32) -> (i32, i32) {
    %c0_i32 = arith.constant 0 : i32
    %c0_i32_0 = arith.constant 0 : i32
    %c0_i32_1 = arith.constant 0 : i32
    return %c0_i32, %c0_i32_0 : i32, i32
  }
  func.func @transform_5(%arg0: i32) -> (i32, i32) {
    %c0_i32 = arith.constant 0 : i32
    %c0_i32_0 = arith.constant 0 : i32
    %c0_i32_1 = arith.constant 0 : i32
    return %c0_i32, %c0_i32_0 : i32, i32
  }
  func.func @transform_6(%arg0: i32) -> (i32, i32) {
    %c0_i32 = arith.constant 0 : i32
    %c0_i32_0 = arith.constant 0 : i32
    %c0_i32_1 = arith.constant 0 : i32
    return %c0_i32, %c0_i32_0 : i32, i32
  }
  func.func @transform_7(%arg0: i32) -> (i32, i32) {
    %c0_i32 = arith.constant 0 : i32
    %c0_i32_0 = arith.constant 0 : i32
    %c0_i32_1 = arith.constant 0 : i32
    return %c0_i32, %c0_i32_0 : i32, i32
  }
  func.func @transform_8(%arg0: i32) -> (i32, i32) {
    %c0_i32 = arith.constant 0 : i32
    %c0_i32_0 = arith.constant 0 : i32
    return %arg0, %c0_i32 : i32, i32
  }
}

</mosaic_0001>

<bundles_post_ra>
// kernel: _forward.1
= control target key start
LH: loop header
LB: loop body
LE: loop exit
PB: predicated region body
PF: predicated region fallthrough
CT: control target
= control target key end

     0   :  { %v423_v3 = vmov 0.0|0.0   ;;  %vm424_vm0 = vmmov 0   ;;  %v425_v6 = vmov 0.0   ;;  %s547_s0 = inlined_call_operand.vmem [shape: f32[8,32], index: 0, kind: input, shape index: {}]   ;;  %s548_s1 = inlined_call_operand.vmem [shape: f32[8,16], index: 1, kind: input, shape index: {}]   ;;  %s549_s2 = inlined_call_operand.vmem [shape: f32[32,64], index: 2, kind: input, shape index: {}]   ;;  %s550_s3 = inlined_call_operand.vmem [shape: f32[1,64], index: 3, kind: input, shape index: {}]   ;;  %s551_s4 = inlined_call_operand.vmem [shape: f32[16,128], index: 4, kind: input, shape index: {}]   ;;  %s552_s5 = inlined_call_operand.vmem [shape: f32[1,128], index: 5, kind: input, shape index: {}]   ;;  %s553_s6 = inlined_call_operand.vmem [shape: f32[64,32], index: 6, kind: input, shape index: {}]   ;;  %s554_s7 = inlined_call_operand.vmem [shape: f32[1,32], index: 7, kind: input, shape index: {}]   ;;  %s555_s8 = inlined_call_operand.hbm [shape: f32[8,32], index: 8, kind: output, shape index: {}]  }
   0x1   :  { %v30_v0 = vld [vmem:[%s549_s2] sm:$0xff]  ;;  %v31_v1 = vld [vmem:[%s549_s2 + $0x8] sm:$0xff]  ;;  %v32_v2 = vld [vmem:[%s549_s2 + $0x10] sm:$0xff]  ;;  %371 = vmatprep.subr.bf16.mxu0 %v423_v3  ;;  %342 = vmatprep.mubr.msk.f32.mxu0 %vm424_vm0, %v425_v6 }
   0x2   :  { %v372_v4 = vpack.c.bf16 %v31_v1, %v30_v0  ;;  %v33_v5 = vld [vmem:[%s549_s2 + $0x18] sm:$0xff]  ;;  %380 = vmatprep.subr.bf16.mxu1 %v423_v3  ;;  %368 = vmatprep.mubr.msk.f32.mxu1 %vm424_vm0, %v425_v6 }
   0x3   :  { %v375_v7 = vpack.c.bf16 %v33_v5, %v32_v2 }
   0x4   :  { %373 = vmatpush3.bf16.msra.mxu0 %v372_v4 }
   0x5   :  { %13 = vsyncpa [#allocation3], 0  ;;  %374 = vmatprep.subr.bf16.mxu0 %v423_v3  ;;  %v35_v8 = vld [vmem:[%s551_s4] sm:$0xff]  ;;  %v36_v9 = vld [vmem:[%s551_s4 + $0x8] sm:$0xff]  ;;  %vm55_vm1 = vcmask 261120   ;;  %vm136_vm2 = vcmask 130048  }
   0x6   :  { %v47_v10 = vld [vmem:[%s547_s0] sm:$0xff]  ;;  %v378_v11 = vpack.c.bf16 %v36_v9, %v35_v8  ;;  %v39_v14 = vld [vmem:[%s553_s6 + $0x8] sm:$0xff]  ;;  %v40_v15 = vld [vmem:[%s553_s6 + $0x10] sm:$0xff]  ;;  %s426_s15 = smov 64   ;;  %vm222_vm3 = vcmask 523264   ;;  %s427_s16 = smov [#allocation2]  }
   0x7   :  { %v48_v12 = vld [vmem:[%s548_s1] sm:$0xff]  ;;  %v41_v17 = vld [vmem:[%s553_s6 + $0x18] sm:$0xff]  ;;  %v43_v20 = vld [vmem:[%s553_s6 + $0x28] sm:$0xff]  ;;  %s303_s2 = sshll.u32 %s427_s16, 4  ;;  %s304_s2 = int_to_ptr.vmem [resolvable:$true] %s303_s2 }
   0x8   :  { %376 = vmatpush3.bf16.msra.mxu0 %v375_v7  ;;  %v38_v13 = vld [vmem:[%s553_s6] sm:$0xff]  ;;  %v384_v18 = vpack.c.bf16 %v41_v17, %v40_v15  ;;  %v44_v22 = vld [vmem:[%s553_s6 + $0x30] sm:$0xff]  ;;  %v45_v23 = vld [vmem:[%s553_s6 + $0x38] sm:$0xff]  ;;  %p404_p1 = scmp.lt.s32.totalorder %s304_s2, %s304_s2 }
   0x9   :  { %377 = vmatprep.subr.bf16.mxu0 %v423_v3  ;;  %v381_v16 = vpack.c.bf16 %v39_v14, %v38_v13  ;;  %v42_v19 = vld [vmem:[%s553_s6 + $0x20] sm:$0xff]  ;;  %v390_v24 = vpack.c.bf16 %v45_v23, %v44_v22 }
   0xa   :  { %v387_v21 = vpack.c.bf16 %v43_v20, %v42_v19  ;;  %v311_v25 = vld [vmem:[%s550_s3] ss:$0 sm:$0xff] }
   0xb   :  { %343 = vmatmul.mubr.msk.f32.vlgmr.msra.gmra.mrb[0].mxu0 %vm55_vm1, %v47_v10  ;;  %382 = vmatpush3.bf16.msra.mxu1 %v381_v16  ;;  %v313_v29 = vld [vmem:[%s552_s5] ss:$0 sm:$0xff]  ;;  %s399_s5 = scalar_lea.vmem %s304_s2, 128 }
   0xc   :  { %379 = vmatpush3.bf16.msra.mxu0 %v378_v11  ;;  %349 = vmatprep.mubr.msk.f32.mxu0 %vm424_vm0, %v425_v6  ;;  %v315_v37 = vld [vmem:[%s554_s7] ss:$0 sm:$0xff]  ;;  %p400_p0 = scmp.ne.s32.totalorder %s304_s2, %s399_s5  ;;  %p405_p2 = scmp.lt.s32.totalorder %s399_s5, %s399_s5 }
   0xd   :  { %383 = vmatprep.subr.bf16.mxu1 %v423_v3 }
   0xe   :  { %p406_p3 = por %p405_p2, %p404_p1 }
   0xf   :  { %350 = vmatmul.mubr.msk.f32.vlgmr.msra.gmra.mrb[2].mxu0 %vm136_vm2, %v48_v12  ;;  %385 = vmatpush3.bf16.msra.mxu1 %v384_v18 }
  0x10   :  { %386 = vmatprep.subr.bf16.mxu1 %v423_v3  ;;  %p407_p4 = pnand %p406_p3, %p400_p0 }
  0x13   :  { %388 = vmatpush3.bf16.msra.mxu1 %v387_v21 }
  0x14   :  { %389 = vmatprep.subr.bf16.mxu1 %v423_v3 }
  0x17   :  { %391 = vmatpush3.bf16.msra.mxu1 %v390_v24 }
  0xde   :  { %v125_v26 = vpop.f32.mrb[0].mxu0 }
  0xdf   :  { %v126_v27 = vadd.f32 %v311_v25, %v125_v26  ;;  %v344_v28 = vpop.f32.mrb[1].mxu0 }
  0xe1   :  { %397 = vtanh.f32 %v126_v27 }
  0xe2   :  { %v206_v30 = vpop.f32.mrb[2].mxu0 }
  0xe3   :  { %v207_v31 = vadd.f32 %v313_v29, %v206_v30  ;;  %v351_v32 = vpop.f32.mrb[3].mxu0 }
  0xe5   :  { %212 = vrot.lane.b32.xlu0 %v207_v31, %s426_s15 }
  0xeb   :  { %v398_v33 = vpop.eup %397 }
  0xec   :  { %v210_v34 = vmul.f32 %v398_v33, %v207_v31 }
 0x157   :  { %v213_v35 = vpop.permute.xlu0 %212 }
 0x158   :  { %v215_v36 = vadd.f32 %v213_v35, %v210_v34 }
 0x15a   :  { %369 = vmatmul.mubr.msk.f32.vlgmr.msra.gmra.mrb[0].mxu1 %vm222_vm3, %v215_v36 }
 0x22d   :  { %v292_v38 = vpop.f32.mrb[0].mxu1 }
 0x22e   :  { %v293_v39 = vadd.f32 %v315_v37, %v292_v38  ;;  %v370_v40 = vpop.f32.mrb[1].mxu1 }
 0x230   :  { %296 = vst.msk [vmem:[#allocation2] sm:$0xff] %vm55_vm1, %v293_v39 }
 0x231   :  { %410 = shalt.err (!%p407_p4)
}
 0x232   :  { %s411_s19 = scalar_lea.hbm %s555_s8, 128 }
 0x233   :  { %p412_p5 = scmp.ne.s32.totalorder %s555_s8, %s411_s19  ;;  %p415_p6 = scmp.lt.u32.totalorder %s411_s19, %s555_s8 }
 0x235   :  { %p417_p7 = pnand %p415_p6, %p412_p5 }
 0x237   :  { %420 = shalt.err (!%p417_p7)
}
 0x238   :  { %306 = dma.vmem_to_hbm [thread:$0]  %s304_s2, 128, %s555_s8, [#allocation3]  }
 0x239   :  { %421 = dma.done.wait [#allocation3], 128  }
 0x23a   :  { %422 = vsyncadd [#allocation3], 4294967168 }
 0x23b   :  { %310 = vsyncpa [#allocation3], 1 }

</bundles_post_ra>
